<compile_context>
chip_gen: v7x
topology: tpu7x:2x2x1
jax: 0.10.0
libtpu: 0.0.40
codegen_flags: <defaults>
</compile_context>

<pallas_src>
import jax
import jax.numpy as jnp
from jax import lax
from jax.experimental import pallas as pl
from jax.experimental.pallas import tpu as pltpu

_LANES = 128                          # last-dim width of the working layout
_VMEM_BUDGET = 20 * 1024 * 1024       # cap on double-buffered block bytes


def _round_up(x, m):
    return ((x + m - 1) // m) * m


def _pick_chunk(r_tile):
    for c in (64, 32, 16, 8):         # rows per in-kernel accumulation chunk
        if r_tile % c == 0:
            return c
    return r_tile                     # tiny full-extent block (< 8 rows)


def _make_kernel(n_fields, r_tile, chunk):
    n_chunks = r_tile // chunk

    def kernel(*refs):
        field_refs = refs[:n_fields]
        out_ref = refs[n_fields]

        def compute_chunk(r0):
            # f32 accumulators, per-field cast; ~(3 + 1)*chunk/8 vregs live.
            e0 = field_refs[0][pl.ds(r0, chunk), :].astype(jnp.float32)
            s, sq = e0, e0 * e0
            for fr in field_refs[1:]:
                e = fr[pl.ds(r0, chunk), :].astype(jnp.float32)
                s = s + e
                sq = sq + e * e
            out_ref[pl.ds(r0, chunk), :] = (
                0.5 * (s * s - sq)).astype(out_ref.dtype)

        if n_chunks == 1:
            compute_chunk(0)
        else:
            def body(c, carry):
                compute_chunk(pl.multiple_of(c * chunk, chunk))
                return carry
            lax.fori_loop(0, n_chunks, body, 0)

    return kernel


def bi_interaction(feature_emb, *, r_tile=2048, interpret=False):
    """NFM bi-interaction pooling.

    feature_emb: list of per-field embeddings, each [B, 1, D] or [B, D]
                 (the arrays PyTorch stacks along dim=1 and squeezes).
    Returns:     [B, D] = 0.5 * ((sum_f e)^2 - sum_f e^2), input dtype.
    """
    fields = [jnp.reshape(x, (x.shape[0], -1)) for x in feature_emb]   # [B, D]
    B, D = fields[0].shape
    n_fields = len(fields)
    dtype = fields[0].dtype
    itemsize = jnp.dtype(dtype).itemsize
    n_elems = B * D

    # --- choose row tile (multiple of 8, VMEM-bounded, >=2 grid steps) ------
    bytes_per_row = 2 * _LANES * (n_fields + 1) * itemsize   # double-buffered
    r_max = max(8, (_VMEM_BUDGET // bytes_per_row) // 8 * 8)
    r_tile = max(8, min((int(r_tile) // 8) * 8, r_max))

    rows = pl.cdiv(n_elems, _LANES)
    if rows < 8:
        r_tile = rows                                # single full-extent block
    elif rows <= r_tile:
        if rows >= 16:                               # feed both v7x TCs
            r_tile = _round_up(pl.cdiv(rows, 2), 8)
        else:
            r_tile = _round_up(rows, 8)
    grid_n = pl.cdiv(rows, r_tile)
    rows_pad = grid_n * r_tile
    n_pad = rows_pad * _LANES

    # --- free relayout: flatten + reshape; pad only when B*D is unaligned ---
    def to_mat(x):
        flat = jnp.reshape(x, (n_elems,))            # contiguous -> no copy
        if n_pad != n_elems:
            flat = jnp.pad(flat, (0, n_pad - n_elems))
        return jnp.reshape(flat, (rows_pad, _LANES))

    mats = [to_mat(x) for x in fields]

    chunk = _pick_chunk(r_tile)
    kernel = _make_kernel(n_fields, r_tile, chunk)
    spec = pl.BlockSpec((r_tile, _LANES), lambda i: (i, 0))

    out2d = pl.pallas_call(
        kernel,
        out_shape=jax.ShapeDtypeStruct((rows_pad, _LANES), dtype),
        grid=(grid_n,),
        in_specs=[spec] * n_fields,
        out_specs=spec,
        compiler_params=pltpu.CompilerParams(
            dimension_semantics=("parallel",),
            vmem_limit_bytes=32 * 1024 * 1024),
        interpret=interpret,
    )(*mats)

    out_flat = jnp.reshape(out2d, (n_pad,))
    if n_pad != n_elems:
        out_flat = out_flat[:n_elems]                # zero-padded tail dropped
    return jnp.reshape(out_flat, (B, D))


def bi_interaction_ref(feature_emb):
    """Pure-JAX reference mirroring the PyTorch forward."""
    e = jnp.stack([jnp.reshape(x, (x.shape[0], -1)) for x in feature_emb],
                  axis=1)                                              # [B,F,D]
    s = jnp.sum(e, axis=1)
    return 0.5 * (s * s - jnp.sum(e * e, axis=1))


if __name__ == "__main__":
    key = jax.random.PRNGKey(0)
    F, D = 6, 10

    def run_case(B, subkey):
        ks = jax.random.split(subkey, F)
        emb = [0.1 * jax.random.normal(ks[i], (B, 1, D), jnp.float32)
               for i in range(F)]
        out = bi_interaction(emb)
        jax.block_until_ready(out)
        ref = bi_interaction_ref(emb)
        assert out.shape == (B, D), out.shape
        assert bool(jnp.all(jnp.isfinite(out)))
        assert bool(jnp.allclose(out, ref, atol=1e-5, rtol=1e-5)), \
            float(jnp.max(jnp.abs(out - ref)))

    k1, k2, k3 = jax.random.split(key, 3)
    run_case(1024, k1)   # aligned: zero-copy path, 2 grid steps (rows 80/40)
    run_case(256, k2)    # unaligned: pad path, 2 grid steps (rows 20 -> 32)
    run_case(50, k3)     # tiny batch: single (4, 128) full-extent block
    print("KERNEL_OK")
</pallas_src>

<mosaic_0001>
module attributes {stable_mosaic.version = 11 : i64} {
  func.func @kernel(%arg0: i32, %arg1: memref<40x128xf32, #tpu.memory_space<vmem>>, %arg2: memref<40x128xf32, #tpu.memory_space<vmem>>, %arg3: memref<40x128xf32, #tpu.memory_space<vmem>>, %arg4: memref<40x128xf32, #tpu.memory_space<vmem>>, %arg5: memref<40x128xf32, #tpu.memory_space<vmem>>, %arg6: memref<40x128xf32, #tpu.memory_space<vmem>>, %arg7: memref<40x128xf32, #tpu.memory_space<vmem>>) attributes {dimension_semantics = [#tpu.dimension_semantics<parallel>], iteration_bounds = array<i64: 2>, scalar_prefetch = 0 : i64, scratch_operands = 0 : i64, tpu.core_type = #tpu.core_type<tc>, window_params = [{transform_indices = @transform_0, window_bounds = array<i64: 40, 128>}, {transform_indices = @transform_1, window_bounds = array<i64: 40, 128>}, {transform_indices = @transform_2, window_bounds = array<i64: 40, 128>}, {transform_indices = @transform_3, window_bounds = array<i64: 40, 128>}, {transform_indices = @transform_4, window_bounds = array<i64: 40, 128>}, {transform_indices = @transform_5, window_bounds = array<i64: 40, 128>}, {transform_indices = @transform_6, window_bounds = array<i64: 40, 128>}]} {
    %c0_i32 = arith.constant 0 : i32
    %c5_i32 = arith.constant 5 : i32
    %0 = arith.addi %c0_i32, %c5_i32 : i32
    %c1_i32 = arith.constant 1 : i32
    scf.for %arg8 = %c0_i32 to %0 step %c1_i32  : i32 {
      %c8_i32 = arith.constant 8 : i32
      %1 = arith.muli %arg8, %c8_i32 : i32
      %2 = tpu.assume_multiple %1, 8 : i32
      %3 = arith.index_cast %2 : i32 to index
      %c0 = arith.constant 0 : index
      %4 = vector.load %arg1[%3, %c0] : memref<40x128xf32, #tpu.memory_space<vmem>>, vector<8x128xf32>
      %5 = arith.mulf %4, %4 : vector<8x128xf32>
      %6 = arith.index_cast %2 : i32 to index
      %c0_1 = arith.constant 0 : index
      %7 = vector.load %arg2[%6, %c0_1] : memref<40x128xf32, #tpu.memory_space<vmem>>, vector<8x128xf32>
      %8 = arith.addf %4, %7 : vector<8x128xf32>
      %9 = arith.mulf %7, %7 : vector<8x128xf32>
      %10 = arith.addf %5, %9 : vector<8x128xf32>
      %11 = arith.index_cast %2 : i32 to index
      %c0_2 = arith.constant 0 : index
      %12 = vector.load %arg3[%11, %c0_2] : memref<40x128xf32, #tpu.memory_space<vmem>>, vector<8x128xf32>
      %13 = arith.addf %8, %12 : vector<8x128xf32>
      %14 = arith.mulf %12, %12 : vector<8x128xf32>
      %15 = arith.addf %10, %14 : vector<8x128xf32>
      %16 = arith.index_cast %2 : i32 to index
      %c0_3 = arith.constant 0 : index
      %17 = vector.load %arg4[%16, %c0_3] : memref<40x128xf32, #tpu.memory_space<vmem>>, vector<8x128xf32>
      %18 = arith.addf %13, %17 : vector<8x128xf32>
      %19 = arith.mulf %17, %17 : vector<8x128xf32>
      %20 = arith.addf %15, %19 : vector<8x128xf32>
      %21 = arith.index_cast %2 : i32 to index
      %c0_4 = arith.constant 0 : index
      %22 = vector.load %arg5[%21, %c0_4] : memref<40x128xf32, #tpu.memory_space<vmem>>, vector<8x128xf32>
      %23 = arith.addf %18, %22 : vector<8x128xf32>
      %24 = arith.mulf %22, %22 : vector<8x128xf32>
      %25 = arith.addf %20, %24 : vector<8x128xf32>
      %26 = arith.index_cast %2 : i32 to index
      %c0_5 = arith.constant 0 : index
      %27 = vector.load %arg6[%26, %c0_5] : memref<40x128xf32, #tpu.memory_space<vmem>>, vector<8x128xf32>
      %28 = arith.addf %23, %27 : vector<8x128xf32>
      %29 = arith.mulf %27, %27 : vector<8x128xf32>
      %30 = arith.addf %25, %29 : vector<8x128xf32>
      %31 = arith.mulf %28, %28 : vector<8x128xf32>
      %32 = arith.subf %31, %30 : vector<8x128xf32>
      %cst = arith.constant 5.000000e-01 : f32
      %33 = vector.broadcast %cst : f32 to vector<8x128xf32>
      %34 = arith.mulf %33, %32 : vector<8x128xf32>
      %35 = arith.index_cast %2 : i32 to index
      %c0_6 = arith.constant 0 : index
      %36 = vector.load %arg7[%35, %c0_6] : memref<40x128xf32, #tpu.memory_space<vmem>>, vector<8x128xf32>
      tpu.vector_store %arg7[%35, %c0_6], %34 {strides = array<i32>} : memref<40x128xf32, #tpu.memory_space<vmem>>, vector<8x128xf32>,
    }
    %c5_i32_0 = arith.constant 5 : i32
    return
  }
  func.func @transform_0(%arg0: i32) -> (i32, i32) {
    %c0_i32 = arith.constant 0 : i32
    %c0_i32_0 = arith.constant 0 : i32
    return %arg0, %c0_i32 : i32, i32
  }
  func.func @transform_1(%arg0: i32) -> (i32, i32) {
    %c0_i32 = arith.constant 0 : i32
    %c0_i32_0 = arith.constant 0 : i32
    return %arg0, %c0_i32 : i32, i32
  }
  func.func @transform_2(%arg0: i32) -> (i32, i32) {
    %c0_i32 = arith.constant 0 : i32
    %c0_i32_0 = arith.constant 0 : i32
    return %arg0, %c0_i32 : i32, i32
  }
  func.func @transform_3(%arg0: i32) -> (i32, i32) {
    %c0_i32 = arith.constant 0 : i32
    %c0_i32_0 = arith.constant 0 : i32
    return %arg0, %c0_i32 : i32, i32
  }
  func.func @transform_4(%arg0: i32) -> (i32, i32) {
    %c0_i32 = arith.constant 0 : i32
    %c0_i32_0 = arith.constant 0 : i32
    return %arg0, %c0_i32 : i32, i32
  }
  func.func @transform_5(%arg0: i32) -> (i32, i32) {
    %c0_i32 = arith.constant 0 : i32
    %c0_i32_0 = arith.constant 0 : i32
    return %arg0, %c0_i32 : i32, i32
  }
  func.func @transform_6(%arg0: i32) -> (i32, i32) {
    %c0_i32 = arith.constant 0 : i32
    %c0_i32_0 = arith.constant 0 : i32
    return %arg0, %c0_i32 : i32, i32
  }
}

</mosaic_0001>

<bundles_post_ra>
// kernel: tpu_custom_call.1
= control target key start
LH: loop header
LB: loop body
LE: loop exit
PB: predicated region body
PF: predicated region fallthrough
CT: control target
= control target key end

     0   :  { %s1567_s0 = inlined_call_operand.hbm [shape: f32[80,128], index: 0, kind: input, shape index: {}]   ;;  %s1568_s1 = inlined_call_operand.hbm [shape: f32[80,128], index: 1, kind: input, shape index: {}]   ;;  %s1569_s2 = inlined_call_operand.hbm [shape: f32[80,128], index: 2, kind: input, shape index: {}]   ;;  %s1570_s3 = inlined_call_operand.hbm [shape: f32[80,128], index: 3, kind: input, shape index: {}]   ;;  %s1571_s4 = inlined_call_operand.hbm [shape: f32[80,128], index: 4, kind: input, shape index: {}]   ;;  %s1572_s5 = inlined_call_operand.hbm [shape: f32[80,128], index: 5, kind: input, shape index: {}]   ;;  %s1573_s6 = inlined_call_operand.hbm [shape: f32[80,128], index: 6, kind: output, shape index: {}]  }
   0x1   :  { %1588 = sst [smem:[#allocation25_spill]] %s1567_s0 }
   0x2   :  { %1589 = sst [smem:[#allocation26_spill]] %s1568_s1 }
   0x3   :  { %1590 = sst [smem:[#allocation27_spill]] %s1570_s3 }
   0x4   :  { %1591 = sst [smem:[#allocation28_spill]] %s1573_s6 }
   0x5   :  { %11 = vsyncpa [#allocation3], 0 }
   0x6   :  { %13 = vsyncpa [#allocation3 + $0x1], 0 }
   0x7   :  { %14 = vsyncpa [#allocation6], 0 }
   0x8   :  { %16 = vsyncpa [#allocation6 + $0x1], 0 }
   0x9   :  { %17 = vsyncpa [#allocation9], 0 }
   0xa   :  { %19 = vsyncpa [#allocation9 + $0x1], 0 }
   0xb   :  { %20 = vsyncpa [#allocation12], 0 }
   0xc   :  { %22 = vsyncpa [#allocation12 + $0x1], 0 }
   0xd   :  { %23 = vsyncpa [#allocation4], 0 }
   0xe   :  { %25 = vsyncpa [#allocation4 + $0x1], 0  ;;  %s1151_s21 = smov 0   ;;  %s1153_s22 = smov 0  }
   0xf   :  { %s1155_s23 = smov 0   ;;  %s1157_s24 = smov 0  }
  0x10 LB: > { %1592 = sst [smem:[#allocation19_spill]] %s1087_s21  ;;  %s1172_s25 = sadd.s32 4294967295, %s1099_s24   ;;  %s1099_s24 = sphi %s1157_s24, %s1620_s24   ;;  %s1095_s23 = sphi %s1155_s23, %s1622_s23   ;;  %s1091_s22 = sphi %s1153_s22, %s1624_s22   ;;  %s1087_s21 = sphi %s1151_s21, %s1623_s21  }
  0x11   : > { %1593 = sst [smem:[#allocation20_spill]] %s1095_s23  ;;  %s726_s26 = sadd.s32 4294967294, %s1099_s24  }
  0x12   : > { %1594 = sst [smem:[#allocation21_spill]] %s1099_s24  ;;  %s1176_s27 = sadd.s32 1, %s1099_s24  }
  0x13   : > { %1595 = sst [smem:[#allocation22_spill]] %s1176_s27  ;;  %s38_s28 = sadd.s32 1, %s1095_s23 }
  0x14   : > { %s35_s29 = ssub.s32 %s1099_s24, %s1176_s27  ;;  %p45_p0 = scmp.ne.s32.totalorder %s1095_s23, %s1091_s22 }
  0x15   : > { %p36_p1 = scmp.eq.s32.totalorder %s35_s29, 0  ;;  %p46_p2 = scmp.eq.s32.totalorder %s1099_s24, 0 }
  0x16   : > { %p51_p3 = scmp.ne.s32.totalorder %s1091_s22, %s1087_s21  ;;  %p52_p4 = scmp.eq.s32.totalorder %s1172_s25, 0 }
  0x17   : > { %s1188_s30 = scalar_select %p36_p1, %s1095_s23, %s38_s28  }
  0x18   : > { %p47_p5 = por %p46_p2, %p45_p0  ;;  %p1190_p6 = por %p52_p4, %p51_p3 }
  0x19   : > { %1596 = sst [smem:[#allocation23_spill]] %s1188_s30  ;;  %p205_p7 = scmp.eq.s32.totalorder %s1172_s25, 1 }
  0x1a   : > { %s1597_s7 = scalar_select %p1190_p6, 1, 0 }
  0x1b   : > { %p211_p8 = scmp.eq.s32.totalorder %s726_s26, 1  ;;  %p791_p10 = scmp.lt.s32.totalorder %s1099_s24, 2 }
  0x1c   : > { %p1197_p11 = por %p205_p7, %p45_p0  ;;  %s1206_s10 = sand.u32 1, %s1095_s23  }
  0x1d   : > { %p1201_p12 = por %p211_p8, %p51_p3  ;;  %s1209_s11 = smul.u32 640, %s1099_s24 }
  0x1e   : > { %s1598_s8 = scalar_select %p1197_p11, 1, 0 }
  0x1f   : > { %s1599_s9 = scalar_select %p1201_p12, 1, 0 }
  0x20   : > { %s1212_s12 = smul.u32 40, %s1206_s10  ;;  %p1214_p13 = pnand %p791_p10, %p47_p5 }
  0x21   : > { %1600 = sst [smem:[#allocation24_spill]] %s1599_s9  ;;  %s1574_s14 = sand.u32 1, %s1099_s24  }
  0x22   : > { %s1602_s1 = sld [smem:[#allocation26_spill]]  ;;  %s256_s18 = scalar_lea.vmem [#allocation5], %s1212_s12 }
  0x23   : > { %s263_s19 = sshll.u32 %s256_s18, 4  ;;  %s1231_s20 = scalar_lea.sflag [#allocation6], %s1574_s14  ;;  %s1226_s19 = int_to_ptr.vmem [resolvable:$true] %s263_s19 }
  0x24   : > { %p1237_p2 = pneg %p1214_p13 }
  0x28   : > { %s1223_s17 = scalar_lea.hbm %s1602_s1, %s1209_s11  ;;  %s842_s16 = scalar_lea.hbm %s1602_s1, 1280 }
  0x29   : > { %s837_s26 = scalar_lea.hbm %s1223_s17, 640  ;;  %p843_p5 = scmp.lt.u32.totalorder %s1223_s17, %s1602_s1 }
  0x2a   : > { %p838_p1 = scmp.ne.s32.totalorder %s1223_s17, %s837_s26  ;;  %p844_p7 = scmp.lt.u32.totalorder %s842_s16, %s837_s26 }
  0x2b   : > { %p846_p10 = scmp.lt.u32.totalorder %s837_s26, %s1223_s17 }
  0x2c   : > { %p840_p3 = pnand %p1237_p2, %p838_p1  ;;  %p845_p8 = por %p844_p7, %p843_p5 }
  0x2e   : > { %p841_p4 = pneg %p840_p3  ;;  %p847_p9 = por %p846_p10, %p845_p8 }
  0x30   : > { %p848_p0 = pnand %p847_p9, %p841_p4 }
  0x32   : > { %851 = shalt.err (!%p848_p0)
}
  0x33   : > { %s852_s14 = scalar_lea.vmem %s1226_s19, 640  ;;  %s1105_s29 = smov [#allocation5]  }
  0x34   : > { %p853_p1 = scmp.ne.s32.totalorder %s1226_s19, %s852_s14  ;;  %s857_s15 = sshll.u32 %s1105_s29, 4  ;;  %s858_s15 = int_to_ptr.vmem [resolvable:$false] %s857_s15 }
  0x35   : > { %s859_s30 = scalar_lea.vmem %s858_s15, 1280  ;;  %p860_p11 = scmp.lt.s32.totalorder %s1226_s19, %s858_s15 }
  0x36   : > { %p855_p3 = pnand %p853_p1, %p1237_p2  ;;  %p861_p6 = scmp.lt.s32.totalorder %s859_s30, %s852_s14 }
  0x38   : > { %p856_p12 = pneg %p855_p3  ;;  %p862_p5 = por %p861_p6, %p860_p11 }
  0x3a   : > { %p863_p7 = pnand %p862_p5, %p856_p12 }
  0x3c   : > { %866 = shalt.err (!%p863_p7)
}
  0x3d   : > { %s1577_s26 = smov 128   ;;  %s1579_s16 = smov 8  }
  0x3e   : > { %774 = dma.hbm_to_vmem [thread:$0]  (!%p1214_p13), %s1223_s17, 640, %s1226_s19, %s1231_s20, %s1577_s26, %s1577_s26, %s1579_s16  }
  0x3f   : > { %p355_p6 = scmp.lt.s32.totalorder %s1099_s24, 3  ;;  %s1604_s3 = sld [smem:[#allocation27_spill]] }
  0x40   : > { %p1605_p9 = scmp.ge.s32.totalorder %s1099_s24, 1  ;;  %s298_s30 = scalar_lea.vmem [#allocation8], %s1212_s12 }
  0x41   : > { %s305_s1 = sshll.u32 %s298_s30, 4  ;;  %s1607_s17 = sand.u32 1, %s1099_s24   ;;  %s1278_s1 = int_to_ptr.vmem [resolvable:$true] %s305_s1 }
  0x42   : > { %p1273_p11 = pnand %p1605_p9, %p355_p6  ;;  %s1282_s19 = scalar_lea.sflag [#allocation9], %s1607_s17 }
  0x44   : > { %s1606_s15 = scalar_select %p1273_p11, 1, 0 }
  0x45   : > { %s1269_s29 = scalar_lea.hbm %s1604_s3, %s1209_s11  ;;  %s872_s16 = scalar_lea.hbm %s1604_s3, 1280 }
  0x46   : > { %s867_s26 = scalar_lea.hbm %s1269_s29, 640  ;;  %p873_p8 = scmp.lt.u32.totalorder %s1269_s29, %s1604_s3 }
  0x47   : > { %p868_p12 = scmp.ne.s32.totalorder %s1269_s29, %s867_s26  ;;  %p874_p10 = scmp.lt.u32.totalorder %s872_s16, %s867_s26 }
  0x48   : > { %p876_p3 = scmp.lt.u32.totalorder %s867_s26, %s1269_s29 }
  0x49   : > { %p870_p0 = pnand %p868_p12, %p1237_p2  ;;  %p875_p1 = por %p874_p10, %p873_p8 }
  0x4b   : > { %p871_p4 = pneg %p870_p0  ;;  %p877_p5 = por %p876_p3, %p875_p1 }
  0x4d   : > { %p878_p7 = pnand %p877_p5, %p871_p4 }
  0x4f   : > { %881 = shalt.err (!%p878_p7)
}
  0x50   : > { %s882_s30 = scalar_lea.vmem %s1278_s1, 640  ;;  %s1108_s17 = smov [#allocation8]  }
  0x51   : > { %p883_p6 = scmp.ne.s32.totalorder %s1278_s1, %s882_s30  ;;  %s887_s14 = sshll.u32 %s1108_s17, 4  ;;  %s888_s14 = int_to_ptr.vmem [resolvable:$false] %s887_s14 }
  0x52   : > { %s889_s23 = scalar_lea.vmem %s888_s14, 1280  ;;  %p890_p0 = scmp.lt.s32.totalorder %s1278_s1, %s888_s14 }
  0x53   : > { %p885_p9 = pnand %p883_p6, %p1237_p2  ;;  %p891_p11 = scmp.lt.s32.totalorder %s889_s23, %s882_s30 }
  0x55   : > { %p886_p12 = pneg %p885_p9  ;;  %p892_p8 = por %p891_p11, %p890_p0 }
  0x57   : > { %p893_p10 = pnand %p892_p8, %p886_p12 }
  0x59   : > { %896 = shalt.err (!%p893_p10)
}
  0x5a   : > { %s1608_s27 = smov 8   ;;  %s1609_s26 = smov 128  }
  0x5b   : > { %780 = dma.hbm_to_vmem [thread:$0]  (!%p1214_p13), %s1269_s29, 640, %s1278_s1, %s1282_s19, %s1609_s26, %s1609_s26, %s1608_s27  }
  0x5c   : > { %s1610_s0 = sld [smem:[#allocation25_spill]]  ;;  %s235_s17 = scalar_lea.vmem [#allocation2], %s1212_s12 }
  0x5d   : > { %s242_s14 = sshll.u32 %s235_s17, 4  ;;  %s1322_s24 = scalar_lea.hbm %s1569_s2, %s1209_s11  ;;  %s1316_s14 = int_to_ptr.vmem [resolvable:$true] %s242_s14 }
  0x5e   : > { %s232_s9 = scalar_lea.sflag [#allocation3], %s1206_s10 }
  0x62   : > { %s1313_s30 = scalar_lea.hbm %s1610_s0, %s1209_s11  ;;  %s902_s18 = scalar_lea.hbm %s1610_s0, 1280 }
  0x63   : > { %s897_s1 = scalar_lea.hbm %s1313_s30, 640  ;;  %p903_p3 = scmp.lt.u32.totalorder %s1313_s30, %s1610_s0 }
  0x64   : > { %p898_p11 = scmp.ne.s32.totalorder %s1313_s30, %s897_s1  ;;  %p904_p5 = scmp.lt.u32.totalorder %s902_s18, %s897_s1 }
  0x65   : > { %p906_p6 = scmp.lt.u32.totalorder %s897_s1, %s1313_s30 }
  0x66   : > { %p900_p4 = pnand %p898_p11, %p1237_p2  ;;  %p905_p7 = por %p904_p5, %p903_p3 }
  0x68   : > { %p901_p1 = pneg %p900_p4  ;;  %p907_p9 = por %p906_p6, %p905_p7 }
  0x6a   : > { %p908_p12 = pnand %p907_p9, %p901_p1 }
  0x6c   : > { %911 = shalt.err (!%p908_p12)
}
  0x6d   : > { %s912_s3 = scalar_lea.vmem %s1316_s14, 640  ;;  %s1109_s17 = smov [#allocation2]  }
  0x6e   : > { %p913_p0 = scmp.ne.s32.totalorder %s1316_s14, %s912_s3  ;;  %s917_s23 = sshll.u32 %s1109_s17, 4  ;;  %s918_s23 = int_to_ptr.vmem [resolvable:$false] %s917_s23 }
  0x6f   : > { %s919_s6 = scalar_lea.vmem %s918_s23, 1280  ;;  %p920_p11 = scmp.lt.s32.totalorder %s1316_s14, %s918_s23 }
  0x70   : > { %p915_p8 = pnand %p913_p0, %p1237_p2  ;;  %p921_p4 = scmp.lt.s32.totalorder %s919_s6, %s912_s3 }
  0x72   : > { %p916_p10 = pneg %p915_p8  ;;  %p922_p3 = por %p921_p4, %p920_p11 }
  0x74   : > { %p923_p5 = pnand %p922_p3, %p916_p10 }
  0x76   : > { %926 = shalt.err (!%p923_p5)
}
  0x77   : > { %771 = dma.hbm_to_vmem [thread:$0]  (!%p1214_p13), %s1313_s30, 640, %s1316_s14, %s232_s9, %s1609_s26, %s1609_s26, %s1608_s27  }
  0x78   : > { %s277_s21 = scalar_lea.vmem [#allocation7], %s1212_s12  ;;  %s1358_s18 = scalar_lea.hbm %s1571_s4, %s1209_s11 }
  0x79   : > { %s284_s1 = sshll.u32 %s277_s21, 4  ;;  %s927_s3 = scalar_lea.hbm %s1322_s24, 640  ;;  %s1352_s1 = int_to_ptr.vmem [resolvable:$true] %s284_s1 }
  0x7a   : > { %p928_p1 = scmp.ne.s32.totalorder %s1322_s24, %s927_s3  ;;  %s932_s6 = scalar_lea.hbm %s1569_s2, 1280 }
  0x7b   : > { %p933_p9 = scmp.lt.u32.totalorder %s1322_s24, %s1569_s2  ;;  %p934_p12 = scmp.lt.u32.totalorder %s932_s6, %s927_s3 }
  0x7c   : > { %p930_p7 = pnand %p928_p1, %p1237_p2  ;;  %p936_p8 = scmp.lt.u32.totalorder %s927_s3, %s1322_s24 }
  0x7d   : > { %p935_p0 = por %p934_p12, %p933_p9 }
  0x7e   : > { %p931_p6 = pneg %p930_p7 }
  0x7f   : > { %p937_p10 = por %p936_p8, %p935_p0 }
  0x81   : > { %p938_p11 = pnand %p937_p10, %p931_p6 }
  0x83   : > { %941 = shalt.err (!%p938_p11)
}
  0x84   : > { %s942_s30 = scalar_lea.vmem %s1352_s1, 640  ;;  %s1110_s14 = smov [#allocation7]  }
  0x85   : > { %p943_p4 = scmp.ne.s32.totalorder %s1352_s1, %s942_s30  ;;  %s947_s21 = sshll.u32 %s1110_s14, 4  ;;  %s948_s21 = int_to_ptr.vmem [resolvable:$false] %s947_s21 }
  0x86   : > { %s949_s0 = scalar_lea.vmem %s948_s21, 1280  ;;  %p950_p1 = scmp.lt.s32.totalorder %s1352_s1, %s948_s21 }
  0x87   : > { %p945_p3 = pnand %p943_p4, %p1237_p2  ;;  %p951_p7 = scmp.lt.s32.totalorder %s949_s0, %s942_s30 }
  0x89   : > { %p946_p5 = pneg %p945_p3  ;;  %p952_p9 = por %p951_p7, %p950_p1 }
  0x8b   : > { %p953_p12 = pnand %p952_p9, %p946_p5 }
  0x8d   : > { %956 = shalt.err (!%p953_p12)
}
  0x8e   : > { %777 = dma.hbm_to_vmem [thread:$0]  (!%p1214_p13), %s1322_s24, 640, %s1352_s1, %s1231_s20, %s1609_s26, %s1609_s26, %s1608_s27  }
  0x8f   : > { %s319_s29 = scalar_lea.vmem [#allocation10], %s1212_s12  ;;  %s957_s3 = scalar_lea.hbm %s1358_s18, 640 }
  0x90   : > { %s326_s16 = sshll.u32 %s319_s29, 4  ;;  %p958_p6 = scmp.ne.s32.totalorder %s1358_s18, %s957_s3  ;;  %s1386_s16 = int_to_ptr.vmem [resolvable:$true] %s326_s16 }
  0x91   : > { %s962_s6 = scalar_lea.hbm %s1571_s4, 1280  ;;  %p963_p10 = scmp.lt.u32.totalorder %s1358_s18, %s1571_s4 }
  0x92   : > { %p960_p0 = pnand %p958_p6, %p1237_p2  ;;  %p964_p11 = scmp.lt.u32.totalorder %s962_s6, %s957_s3 }
  0x93   : > { %p966_p3 = scmp.lt.u32.totalorder %s957_s3, %s1358_s18 }
  0x94   : > { %p961_p8 = pneg %p960_p0  ;;  %p965_p4 = por %p964_p11, %p963_p10 }
  0x96   : > { %p967_p5 = por %p966_p3, %p965_p4 }
  0x98   : > { %p968_p1 = pnand %p967_p5, %p961_p8 }
  0x9a   : > { %971 = shalt.err (!%p968_p1)
}
  0x9b   : > { %s972_s24 = scalar_lea.vmem %s1386_s16, 640  ;;  %s1111_s20 = smov [#allocation10]  }
  0x9c   : > { %p973_p7 = scmp.ne.s32.totalorder %s1386_s16, %s972_s24  ;;  %s977_s1 = sshll.u32 %s1111_s20, 4  ;;  %s978_s1 = int_to_ptr.vmem [resolvable:$false] %s977_s1 }
  0x9d   : > { %s979_s14 = scalar_lea.vmem %s978_s1, 1280  ;;  %p980_p6 = scmp.lt.s32.totalorder %s1386_s16, %s978_s1 }
  0x9e   : > { %p975_p9 = pnand %p973_p7, %p1237_p2  ;;  %p981_p0 = scmp.lt.s32.totalorder %s979_s14, %s972_s24 }
  0xa0   : > { %p976_p12 = pneg %p975_p9  ;;  %p982_p10 = por %p981_p0, %p980_p6 }
  0xa2   : > { %p983_p11 = pnand %p982_p10, %p976_p12 }
  0xa4   : > { %986 = shalt.err (!%p983_p11)
}
  0xa5   : > { %783 = dma.hbm_to_vmem [thread:$0]  (!%p1214_p13), %s1358_s18, 640, %s1386_s16, %s1282_s19, %s1609_s26, %s1609_s26, %s1608_s27  }
  0xa6   : > { %s1417_s29 = scalar_lea.hbm %s1572_s5, %s1209_s11  ;;  %s340_s3 = scalar_lea.vmem [#allocation11], %s1212_s12 }
  0xa7   : > { %s347_s17 = sshll.u32 %s340_s3, 4  ;;  %s337_s23 = scalar_lea.sflag [#allocation12], %s1206_s10  ;;  %s1420_s17 = int_to_ptr.vmem [resolvable:$true] %s347_s17 }
  0xa8   : > { %s987_s6 = scalar_lea.hbm %s1417_s29, 640  ;;  %s992_s16 = scalar_lea.hbm %s1572_s5, 1280 }
  0xa9   : > { %p988_p8 = scmp.ne.s32.totalorder %s1417_s29, %s987_s6  ;;  %p993_p5 = scmp.lt.u32.totalorder %s1417_s29, %s1572_s5 }
  0xaa   : > { %p994_p1 = scmp.lt.u32.totalorder %s992_s16, %s987_s6  ;;  %p996_p9 = scmp.lt.u32.totalorder %s987_s6, %s1417_s29 }
  0xab   : > { %p990_p4 = pnand %p988_p8, %p1237_p2 }
  0xac   : > { %p995_p7 = por %p994_p1, %p993_p5 }
  0xad   : > { %p991_p3 = pneg %p990_p4 }
  0xae   : > { %p997_p12 = por %p996_p9, %p995_p7 }
  0xb0   : > { %p998_p6 = pnand %p997_p12, %p991_p3 }
  0xb2   : > { %1001 = shalt.err (!%p998_p6)
}
  0xb3   : > { %s1002_s12 = scalar_lea.vmem %s1420_s17, 640  ;;  %s1112_s30 = smov [#allocation11]  }
  0xb4   : > { %p1003_p0 = scmp.ne.s32.totalorder %s1420_s17, %s1002_s12  ;;  %s1007_s24 = sshll.u32 %s1112_s30, 4  ;;  %s1008_s24 = int_to_ptr.vmem [resolvable:$false] %s1007_s24 }
  0xb5   : > { %s1009_s20 = scalar_lea.vmem %s1008_s24, 1280  ;;  %p1010_p8 = scmp.lt.s32.totalorder %s1420_s17, %s1008_s24 }
  0xb6   : > { %p1005_p10 = pnand %p1003_p0, %p1237_p2  ;;  %p1011_p4 = scmp.lt.s32.totalorder %s1009_s20, %s1002_s12 }
  0xb8   : > { %p1006_p11 = pneg %p1005_p10  ;;  %p1012_p5 = por %p1011_p4, %p1010_p8 }
  0xba   : > { %p1013_p1 = pnand %p1012_p5, %p1006_p11 }
  0xbc   : > { %1016 = shalt.err (!%p1013_p1)
}
  0xbd   : > { %786 = dma.hbm_to_vmem [thread:$0]  (!%p1214_p13), %s1417_s29, 640, %s1420_s17, %s337_s23, %s1609_s26, %s1609_s26, %s1608_s27  }
  0xbe   : > { %p1611_p2 = scmp.ne.s32.totalorder %s1606_s15, 0 }
  0xbf   : > { %s1452_s28 = sand.u32 (!%p1611_p2), 1, %s1091_s22   ;;  %p1612_p3 = scmp.ne.s32.totalorder (!%p1611_p2), %s1597_s7, 0 }
  0xc0   : > { %359 = sbr.rel (%p1611_p2) target bundleno = 245 (0xf5), region = 44  ;;  %s362_s13 = scalar_lea.sflag (!%p1611_p2), [#allocation3], %s1452_s28 }
  0xc1   : > { %s1455_s1 = smul.u32 (!%p1611_p2), 40, %s1452_s28 }
  0xc3   : > { %s365_s14 = scalar_lea.vmem (!%p1611_p2), [#allocation2], %s1455_s1 }
  0xc7   : > { %1066 = dma.done.wait (%p1612_p3), %s362_s13, 640  }
  0xc8   : > { %1068 = vsyncadd (%p1612_p3), %s362_s13, 4294966656  ;;  %s370_s10 = sand.u32 1, %s1172_s25   ;;  %s374_s27 = scalar_lea.vmem [#allocation5], %s1455_s1 }
  0xc9   : > { %s371_s15 = scalar_lea.sflag [#allocation6], %s370_s10 }
  0xca   : > { %1070 = dma.done.wait (%p1612_p3), %s371_s15, 1280  }
  0xcb   : > { %1072 = vsyncadd (%p1612_p3), %s371_s15, 4294966016  ;;  %s383_s26 = scalar_lea.vmem [#allocation7], %s1455_s1  ;;  %s389_s21 = scalar_lea.sflag [#allocation9], %s370_s10 }
  0xcc   : > { %s392_s0 = scalar_lea.vmem [#allocation8], %s1455_s1 }
  0xcd   : > { %1074 = dma.done.wait (%p1612_p3), %s389_s21, 1280  }
  0xce   : > { %1076 = vsyncadd (%p1612_p3), %s389_s21, 4294966016  ;;  %s401_s29 = scalar_lea.vmem [#allocation10], %s1455_s1  ;;  %s407_s3 = scalar_lea.sflag [#allocation12], %s1452_s28 }
  0xcf   : > { %s410_s17 = scalar_lea.vmem [#allocation11], %s1455_s1 }
  0xd0   : > { %1078 = dma.done.wait (%p1612_p3), %s407_s3, 640  }
  0xd1   : > { %1080 = vsyncadd (%p1612_p3), %s407_s3, 4294966656  ;;  %s463_s23 = scalar_lea.vmem [#allocation13], %s1455_s1  ;;  %s1483_s6 = smov 0  }
  0xd2 LB: >> { %s1489_s19 = sshll.u32 %s1103_s6, 3  ;;  %s476_s6 = sadd.s32 1, %s1103_s6   ;;  %s1103_s6 = sphi %s1483_s6, %s476_s6  }
  0xd3   : >> { %s478_s7 = scalar_lea.vmem %s365_s14, %s1489_s19 [#allocation2]  ;;  %s481_s18 = scalar_lea.vmem %s374_s27, %s1489_s19 [#allocation5] }
  0xd4   : >> { %v479_v0 = vld [vmem:[%s478_s7] sm:$0xff]  ;;  %s486_s16 = scalar_lea.vmem %s383_s26, %s1489_s19 [#allocation7]  ;;  %s491_s11 = scalar_lea.vmem %s392_s0, %s1489_s19 [#allocation8] }
  0xd5   : >> { %v482_v1 = vld [vmem:[%s481_s18] sm:$0xff]  ;;  %v480_v2 = vmul.f32 %v479_v0, %v479_v0  ;;  %s496_s9 = scalar_lea.vmem %s401_s29, %s1489_s19 [#allocation10]  ;;  %s501_s12 = scalar_lea.vmem %s410_s17, %s1489_s19 [#allocation11] }
  0xd6   : >> { %v483_v3 = vadd.f32 %v482_v1, %v479_v0  ;;  %v484_v4 = vmul.f32 %v482_v1, %v482_v1  ;;  %v487_v5 = vld [vmem:[%s486_s16] sm:$0xff]  ;;  %s509_s30 = scalar_lea.vmem %s463_s23, %s1489_s19 [#allocation13]  ;;  %p473_p13 = scmp.ge.s32.totalorder %s476_s6, 5  }
  0xd7   : >> { %v492_v6 = vld [vmem:[%s491_s11] sm:$0xff]  ;;  %v489_v7 = vmul.f32 %v487_v5, %v487_v5  ;;  %s746_s24 = smul.u32 (%p473_p13), 640, %s1172_s25  ;;  %s525_s20 = sshll.u32 (%p473_p13), %s463_s23, 4  ;;  %s1523_s20 = int_to_ptr.vmem [resolvable:$true] %s525_s20 }
  0xd8   : >> { %v497_v8 = vld [vmem:[%s496_s9] sm:$0xff]  ;;  %v485_v9 = vadd.f32 %v484_v4, %v480_v2  ;;  %v488_v10 = vadd.f32 %v487_v5, %v483_v3  ;;  %v494_v11 = vmul.f32 %v492_v6, %v492_v6  ;;  %s1613_s15 = sld [smem:[#allocation28_spill]] (%p473_p13)  ;;  %s512_s3 = scalar_lea.sflag (%p473_p13), [#allocation4], %s1452_s28 }
  0xd9   : >> { %v502_v12 = vld [vmem:[%s501_s12] sm:$0xff]  ;;  %v499_v15 = vmul.f32 %v497_v8, %v497_v8  ;;  %s1017_s6 = scalar_lea.vmem (%p473_p13), %s1523_s20, 640  ;;  %p1614_p9 = scmp.ne.s32.totalorder (%p473_p13), %s1598_s8, 0 }
  0xda   : >> { %v490_v13 = vadd.f32 %v489_v7, %v485_v9  ;;  %v493_v14 = vadd.f32 %v492_v6, %v488_v10  ;;  %v504_v18 = vmul.f32 %v502_v12, %v502_v12  ;;  %p1018_p7 = scmp.ne.s32.totalorder (%p473_p13), %s1523_s20, %s1017_s6  ;;  %s1113_s14 = smov (%p473_p13), [#allocation13]  }
  0xdb   : > { %s1021_s25 = sshll.u32 (%p473_p13), %s1113_s14, 4  ;;  %s1022_s25 = int_to_ptr.vmem [resolvable:$false] %s1021_s25 }
  0xdc   : >> { %v495_v16 = vadd.f32 %v494_v11, %v490_v13  ;;  %v498_v17 = vadd.f32 %v497_v8, %v493_v14  ;;  %p1019_p12 = pnand (%p473_p13), %p1018_p7, %p1614_p9  ;;  %s1023_s1 = scalar_lea.vmem (%p473_p13), %s1022_s25, 1280 }
  0xdd   : > { %p1024_p0 = scmp.lt.s32.totalorder (%p473_p13), %s1523_s20, %s1022_s25  ;;  %p1025_p10 = scmp.lt.s32.totalorder (%p473_p13), %s1023_s1, %s1017_s6 }
  0xde   : >> { %v500_v19 = vadd.f32 %v499_v15, %v495_v16  ;;  %v503_v20 = vadd.f32 %v502_v12, %v498_v17  ;;  %s1521_s21 = scalar_lea.hbm (%p473_p13), %s1613_s15, %s746_s24  ;;  %p1020_p6 = pneg (%p473_p13), %p1019_p12 }
  0xdf   : > { %p1026_p11 = por (%p473_p13), %p1025_p10, %p1024_p0 }
  0xe0   : >> { %v505_v21 = vadd.f32 %v504_v18, %v500_v19  ;;  %v506_v22 = vmul.f32 %v503_v20, %v503_v20  ;;  %475 = sbr.rel (!%p473_p13) target bundleno = 210 (0xd2), region = 164 }
  0xe1   : > { %p1027_p8 = pnand (%p473_p13), %p1026_p11, %p1020_p6 }
  0xe2   : >> { %v507_v23 = vsub.f32 %v506_v22, %v505_v21 }
  0xe4   : >> { %v508_v24 = vmul.f32 0.5, %v507_v23 }
  0xe6   : >> { %510 = vst [vmem:[%s509_s30] sm:$0xff] %v508_v24 }
  0xe7   : > { %1030 = shalt.err (!%p1027_p8)
}
  0xe8   : > { %s1031_s27 = scalar_lea.hbm %s1521_s21, 640  ;;  %s1035_s29 = scalar_lea.hbm %s1613_s15, 1280 }
  0xe9   : > { %p1032_p4 = scmp.ne.s32.totalorder %s1521_s21, %s1031_s27  ;;  %p1036_p2 = scmp.lt.u32.totalorder %s1521_s21, %s1613_s15 }
  0xea   : > { %p1037_p3 = scmp.lt.u32.totalorder %s1035_s29, %s1031_s27  ;;  %p1039_p7 = scmp.lt.u32.totalorder %s1031_s27, %s1521_s21 }
  0xeb   : > { %p1033_p5 = pnand %p1032_p4, %p1614_p9 }
  0xec   : > { %p1038_p13 = por %p1037_p3, %p1036_p2 }
  0xed   : > { %p1034_p1 = pneg %p1033_p5 }
  0xee   : > { %p1040_p12 = por %p1039_p7, %p1038_p13 }
  0xf0   : > { %p1041_p6 = pnand %p1040_p12, %p1034_p1 }
  0xf2   : > { %1044 = shalt.err (!%p1041_p6)
}
  0xf3   : > { %s1114_s19 = smov 128   ;;  %s1115_s7 = smov 8  }
  0xf4   : > { %766 = dma.vmem_to_hbm [thread:$0]  (%p1614_p9), %s1523_s20, 640, %s1521_s21, %s512_s3, %s1114_s19, %s1114_s19, %s1115_s7  }
  0xf5 PF: > { %s1615_s18 = sld [smem:[#allocation19_spill]]  ;;  %s1616_s16 = sld [smem:[#allocation24_spill]] }
  0xf6   : > { %s1617_s11 = sld [smem:[#allocation21_spill]] }
  0xfb   : > { %s540_s9 = sand.u32 1, %s1615_s18   ;;  %p1618_p0 = scmp.ne.s32.totalorder %s1616_s16, 0 }
  0xfc   : > { %p1619_p10 = scmp.ge.s32.totalorder %s1617_s11, 2  ;;  %s541_s12 = scalar_lea.sflag [#allocation4], %s540_s9 }
  0xfe   : > { %p788_p11 = pnand %p1619_p10, %p1618_p0 }
 0x100   : > { %1082 = dma.done.wait (!%p788_p11), %s541_s12, 640  }
 0x101   : > { %1084 = vsyncadd (!%p788_p11), %s541_s12, 4294966656  ;;  %s1620_s24 = sld [smem:[#allocation22_spill]]  ;;  %s1621_s30 = sld [smem:[#allocation20_spill]] }
 0x102   : > { %s1622_s23 = sld [smem:[#allocation23_spill]]  ;;  %s1623_s21 = smov %s1091_s22 }
 0x107   : > { %p28_p8 = scmp.ge.s32.totalorder %s1620_s24, 4   ;;  %s1624_s22 = smov %s1621_s30 }
 0x109   :  { %30 = sbr.rel (!%p28_p8) target bundleno = 16 (0x10), region = 175 }
 0x110   :  { %546 = vsyncpa [#allocation3], 1 }
 0x111   :  { %548 = vsyncpa [#allocation3 + $0x1], 1 }
 0x112   :  { %549 = vsyncpa [#allocation6], 1 }
 0x113   :  { %551 = vsyncpa [#allocation6 + $0x1], 1 }
 0x114   :  { %552 = vsyncpa [#allocation9], 1 }
 0x115   :  { %554 = vsyncpa [#allocation9 + $0x1], 1 }
 0x116   :  { %555 = vsyncpa [#allocation12], 1 }
 0x117   :  { %557 = vsyncpa [#allocation12 + $0x1], 1 }
 0x118   :  { %558 = vsyncpa [#allocation4], 1 }
 0x119   :  { %560 = vsyncpa [#allocation4 + $0x1], 1 }

</bundles_post_ra>
